<compile_context>
chip_gen: v5e
topology: v5e:2x2
jax: 0.10.0
libtpu: 0.0.40
codegen_flags: <defaults>
</compile_context>

<pallas_src>
import jax
import jax.numpy as jnp
from jax.experimental import pallas as pl
from jax.experimental.pallas import tpu as pltpu


# ----------------------------------------------------------------------------
# Fused kernel: conv(3x3, same) + bias + ReLU  ->  flatten  ->  head Linear
#   p_ref : (B, C*9, H*W)        im2col'd input, transposed (spatial lane-dense)
#   cw_ref: (C_out, C*9)         flattened conv weight
#   cb_ref: (C_out, 1)           conv bias (lane-broadcast)
#   hw_ref: (C_out, H*W, N)      head weight pre-permuted to (c, p, n)
#   hb_ref: (1, N)               head bias
#   o_ref : (B, N)               logits
# ----------------------------------------------------------------------------
def _fused_single_head_kernel(p_ref, cw_ref, cb_ref, hw_ref, hb_ref, o_ref):
    B = p_ref.shape[0]
    C_out = cw_ref.shape[0]

    cw = cw_ref[...]                                   # (C_out, C*9)
    cb = cb_ref[...]                                   # (C_out, 1)

    # feature model: one (C_out, C*9) @ (C*9, H*W) matmul per image, kept
    # entirely in VMEM / registers (never written back to HBM).
    convs = []
    for b in range(B):                                 # B small & static -> unrolled
        acc = jnp.dot(cw, p_ref[b], preferred_element_type=jnp.float32)
        convs.append(jnp.maximum(acc + cb, 0.0))       # (C_out, H*W)

    # head: logits[b, n] = sum_{c,p} conv_b[c, p] * hw[c, p, n] + hb[n]
    # done as C_out small (B, H*W) @ (H*W, N) matmuls to avoid any in-kernel
    # sublane->lane reshape of the activations.
    logits = jnp.zeros(o_ref.shape, dtype=jnp.float32)
    for c in range(C_out):                             # static -> unrolled
        rows = jnp.concatenate([cv[c:c + 1, :] for cv in convs], axis=0)  # (B, H*W)
        logits = logits + jnp.dot(rows, hw_ref[c],
                                  preferred_element_type=jnp.float32)     # (B, N)

    o_ref[...] = (logits + hb_ref[...]).astype(o_ref.dtype)


def fused_single_head(patches, cw, cb, hw3, hb):
    B, CK, HW = patches.shape
    C_out, _, N = hw3.shape
    flops = 2 * B * C_out * CK * HW + 2 * B * C_out * HW * N
    bytes_accessed = 4 * (patches.size + cw.size + cb.size + hw3.size + hb.size + B * N)
    vmem_spec = lambda: pl.BlockSpec(memory_space=pltpu.MemorySpace.VMEM)
    return pl.pallas_call(
        _fused_single_head_kernel,
        out_shape=jax.ShapeDtypeStruct((B, N), jnp.float32),
        in_specs=[vmem_spec() for _ in range(5)],
        out_specs=vmem_spec(),
        cost_estimate=pl.CostEstimate(flops=flops, transcendentals=0,
                                      bytes_accessed=bytes_accessed),
    )(patches, cw, cb, hw3, hb)


# ----------------------------------------------------------------------------
# Glue: im2col (pure layout plumbing in XLA) + one-time parameter permutation
# ----------------------------------------------------------------------------
def im2col_3x3_same_T(x):
    """x: (B, C, H, W) NCHW -> (B, C*9, H*W); patch axis ordered (c, kh, kw)."""
    # TODO(synk): folding this gather into the kernel needs sublane->lane merges
    # of misaligned slices; kept as XLA layout plumbing (cheap: 73 KiB).
    B, C, H, W = x.shape
    xp = jnp.pad(x, ((0, 0), (0, 0), (1, 1), (1, 1)))
    cols = [xp[:, :, kh:kh + H, kw:kw + W] for kh in range(3) for kw in range(3)]
    patches = jnp.stack(cols, axis=2)                  # (B, C, 9, H, W)
    return patches.reshape(B, C * 9, H * W)


def prepare_params(conv_w, conv_b, head_w, head_b, H, W):
    """One-time (amortized) parameter re-layout; no per-call transposes."""
    C_out = conv_w.shape[0]
    N = head_w.shape[0]
    cw = conv_w.reshape(C_out, -1).astype(jnp.float32)          # (C_out, C*9)
    cb = conv_b.reshape(C_out, 1).astype(jnp.float32)           # (C_out, 1)
    # PyTorch flattens features in (c, h, w) order; the kernel produces them as
    # (c, p = h*W + w), so permute the head weight once to (c, p, n).
    hw3 = head_w.reshape(N, C_out, H * W).transpose(1, 2, 0).astype(jnp.float32)
    hb = head_b.reshape(1, N).astype(jnp.float32)               # (1, N)
    return cw, cb, hw3, hb


@jax.jit
def single_head_forward(x, cw, cb, hw3, hb):
    """SingleHead.forward: feature_model(x) -> view(B, -1) -> head Linear."""
    patches = im2col_3x3_same_T(x)                     # (B, C*9, H*W)
    return fused_single_head(patches, cw, cb, hw3, hb)


# ----------------------------------------------------------------------------
# Pure-JAX reference (for correctness check only)
# ----------------------------------------------------------------------------
def reference_forward(x, conv_w, conv_b, head_w, head_b):
    y = jax.lax.conv_general_dilated(
        x, conv_w, window_strides=(1, 1), padding=((1, 1), (1, 1)),
        dimension_numbers=("NCHW", "OIHW", "NCHW"),
        precision=jax.lax.Precision.HIGHEST)
    y = jnp.maximum(y + conv_b[None, :, None, None], 0.0)
    feats = y.reshape(y.shape[0], -1)
    return jnp.dot(feats, head_w.T, precision=jax.lax.Precision.HIGHEST) + head_b[None, :]


if __name__ == "__main__":
    # Small shapes consistent with the module: batch=2, channels=4, spatial=16
    B, C, H, W = 2, 4, 16, 16
    C_OUT = 8
    N_CLASSES = 10
    NUM_FEATURES = C_OUT * H * W  # what __calculate_num_features__ would compute

    key = jax.random.PRNGKey(0)
    kx, k1, k2, k3, k4 = jax.random.split(key, 5)

    x = jax.random.normal(kx, (B, C, H, W), dtype=jnp.float32)

    # Deterministic synthetic parameters (no checkpoint loading)
    conv_w = 0.1 * jax.random.normal(k1, (C_OUT, C, 3, 3), dtype=jnp.float32)
    conv_b = 0.1 * jax.random.normal(k2, (C_OUT,), dtype=jnp.float32)
    head_w = 0.02 * jax.random.normal(k3, (N_CLASSES, NUM_FEATURES), dtype=jnp.float32)
    head_b = 0.02 * jax.random.normal(k4, (N_CLASSES,), dtype=jnp.float32)

    cw, cb, hw3, hb = prepare_params(conv_w, conv_b, head_w, head_b, H, W)

    logits = single_head_forward(x, cw, cb, hw3, hb)
    jax.block_until_ready(logits)
    assert logits.shape == (B, N_CLASSES)

    ref = reference_forward(x, conv_w, conv_b, head_w, head_b)
    assert jnp.allclose(logits, ref, atol=1e-3, rtol=1e-3), (
        f"max abs err {jnp.max(jnp.abs(logits - ref))}")

    print("KERNEL_OK")
</pallas_src>

<mosaic_0001>
module attributes {stable_mosaic.version = 11 : i64} {
  func.func @_fused_single_head_kernel(%arg0: memref<2x36x256xf32, #tpu.memory_space<vmem>>, %arg1: memref<8x36xf32, #tpu.memory_space<vmem>>, %arg2: memref<8x1xf32, #tpu.memory_space<vmem>>, %arg3: memref<8x256x10xf32, #tpu.memory_space<vmem>>, %arg4: memref<1x10xf32, #tpu.memory_space<vmem>>, %arg5: memref<2x10xf32, #tpu.memory_space<vmem>>) attributes {dimension_semantics = [], scalar_prefetch = 0 : i64, scratch_operands = 0 : i64, tpu.core_type = #tpu.core_type<tc>} {
    %c0 = arith.constant 0 : index
    %c0_0 = arith.constant 0 : index
    %0 = vector.load %arg1[%c0, %c0_0] : memref<8x36xf32, #tpu.memory_space<vmem>>, vector<8x36xf32>
    %c0_1 = arith.constant 0 : index
    %c0_2 = arith.constant 0 : index
    %1 = vector.load %arg2[%c0_1, %c0_2] : memref<8x1xf32, #tpu.memory_space<vmem>>, vector<8x1xf32>
    %c0_3 = arith.constant 0 : index
    %c0_4 = arith.constant 0 : index
    %c0_5 = arith.constant 0 : index
    %2 = vector.load %arg0[%c0_3, %c0_4, %c0_5] : memref<2x36x256xf32, #tpu.memory_space<vmem>>, vector<1x36x256xf32>
    %3 = vector.shape_cast %2 : vector<1x36x256xf32> to vector<36x256xf32>
    %cst = arith.constant dense<0.000000e+00> : vector<8x256xf32>
    %4 = tpu.matmul %0, %3, %cst {dimension_numbers = #tpu.dot_dimension_numbers<[1], [0], [0], [1], [0, 0, 1, 1], [], []>} : vector<8x36xf32>, vector<36x256xf32>, vector<8x256xf32> -> vector<8x256xf32>
    %5 = vector.broadcast %1 : vector<8x1xf32> to vector<8x256xf32>
    %6 = arith.addf %4, %5 : vector<8x256xf32>
    %cst_6 = arith.constant 0.000000e+00 : f32
    %7 = vector.broadcast %cst_6 : f32 to vector<8x256xf32>
    %8 = arith.maximumf %6, %7 : vector<8x256xf32>
    %c1 = arith.constant 1 : index
    %c0_7 = arith.constant 0 : index
    %c0_8 = arith.constant 0 : index
    %9 = vector.load %arg0[%c1, %c0_7, %c0_8] : memref<2x36x256xf32, #tpu.memory_space<vmem>>, vector<1x36x256xf32>
    %10 = vector.shape_cast %9 : vector<1x36x256xf32> to vector<36x256xf32>
    %cst_9 = arith.constant dense<0.000000e+00> : vector<8x256xf32>
    %11 = tpu.matmul %0, %10, %cst_9 {dimension_numbers = #tpu.dot_dimension_numbers<[1], [0], [0], [1], [0, 0, 1, 1], [], []>} : vector<8x36xf32>, vector<36x256xf32>, vector<8x256xf32> -> vector<8x256xf32>
    %12 = vector.broadcast %1 : vector<8x1xf32> to vector<8x256xf32>
    %13 = arith.addf %11, %12 : vector<8x256xf32>
    %cst_10 = arith.constant 0.000000e+00 : f32
    %14 = vector.broadcast %cst_10 : f32 to vector<8x256xf32>
    %15 = arith.maximumf %13, %14 : vector<8x256xf32>
    %cst_11 = arith.constant 0.000000e+00 : f32
    %16 = vector.broadcast %cst_11 : f32 to vector<2x10xf32>
    %17 = vector.extract_strided_slice %8 {offsets = [0, 0], sizes = [1, 256], strides = [1, 1]} : vector<8x256xf32> to vector<1x256xf32>
    %18 = vector.extract_strided_slice %15 {offsets = [0, 0], sizes = [1, 256], strides = [1, 1]} : vector<8x256xf32> to vector<1x256xf32>
    %19 = tpu.concatenate %17, %18 in 0 : vector<1x256xf32>, vector<1x256xf32> -> vector<2x256xf32>
    %c0_12 = arith.constant 0 : index
    %c0_13 = arith.constant 0 : index
    %c0_14 = arith.constant 0 : index
    %20 = vector.load %arg3[%c0_12, %c0_13, %c0_14] : memref<8x256x10xf32, #tpu.memory_space<vmem>>, vector<1x256x10xf32>
    %21 = vector.shape_cast %20 : vector<1x256x10xf32> to vector<256x10xf32>
    %cst_15 = arith.constant dense<0.000000e+00> : vector<2x10xf32>
    %22 = tpu.matmul %19, %21, %cst_15 {dimension_numbers = #tpu.dot_dimension_numbers<[1], [0], [0], [1], [0, 0, 1, 1], [], []>} : vector<2x256xf32>, vector<256x10xf32>, vector<2x10xf32> -> vector<2x10xf32>
    %23 = arith.addf %16, %22 : vector<2x10xf32>
    %24 = vector.extract_strided_slice %8 {offsets = [1, 0], sizes = [1, 256], strides = [1, 1]} : vector<8x256xf32> to vector<1x256xf32>
    %25 = vector.extract_strided_slice %15 {offsets = [1, 0], sizes = [1, 256], strides = [1, 1]} : vector<8x256xf32> to vector<1x256xf32>
    %26 = tpu.concatenate %24, %25 in 0 : vector<1x256xf32>, vector<1x256xf32> -> vector<2x256xf32>
    %c1_16 = arith.constant 1 : index
    %c0_17 = arith.constant 0 : index
    %c0_18 = arith.constant 0 : index
    %27 = vector.load %arg3[%c1_16, %c0_17, %c0_18] : memref<8x256x10xf32, #tpu.memory_space<vmem>>, vector<1x256x10xf32>
    %28 = vector.shape_cast %27 : vector<1x256x10xf32> to vector<256x10xf32>
    %cst_19 = arith.constant dense<0.000000e+00> : vector<2x10xf32>
    %29 = tpu.matmul %26, %28, %cst_19 {dimension_numbers = #tpu.dot_dimension_numbers<[1], [0], [0], [1], [0, 0, 1, 1], [], []>} : vector<2x256xf32>, vector<256x10xf32>, vector<2x10xf32> -> vector<2x10xf32>
    %30 = arith.addf %23, %29 : vector<2x10xf32>
    %31 = vector.extract_strided_slice %8 {offsets = [2, 0], sizes = [1, 256], strides = [1, 1]} : vector<8x256xf32> to vector<1x256xf32>
    %32 = vector.extract_strided_slice %15 {offsets = [2, 0], sizes = [1, 256], strides = [1, 1]} : vector<8x256xf32> to vector<1x256xf32>
    %33 = tpu.concatenate %31, %32 in 0 : vector<1x256xf32>, vector<1x256xf32> -> vector<2x256xf32>
    %c2 = arith.constant 2 : index
    %c0_20 = arith.constant 0 : index
    %c0_21 = arith.constant 0 : index
    %34 = vector.load %arg3[%c2, %c0_20, %c0_21] : memref<8x256x10xf32, #tpu.memory_space<vmem>>, vector<1x256x10xf32>
    %35 = vector.shape_cast %34 : vector<1x256x10xf32> to vector<256x10xf32>
    %cst_22 = arith.constant dense<0.000000e+00> : vector<2x10xf32>
    %36 = tpu.matmul %33, %35, %cst_22 {dimension_numbers = #tpu.dot_dimension_numbers<[1], [0], [0], [1], [0, 0, 1, 1], [], []>} : vector<2x256xf32>, vector<256x10xf32>, vector<2x10xf32> -> vector<2x10xf32>
    %37 = arith.addf %30, %36 : vector<2x10xf32>
    %38 = vector.extract_strided_slice %8 {offsets = [3, 0], sizes = [1, 256], strides = [1, 1]} : vector<8x256xf32> to vector<1x256xf32>
    %39 = vector.extract_strided_slice %15 {offsets = [3, 0], sizes = [1, 256], strides = [1, 1]} : vector<8x256xf32> to vector<1x256xf32>
    %40 = tpu.concatenate %38, %39 in 0 : vector<1x256xf32>, vector<1x256xf32> -> vector<2x256xf32>
    %c3 = arith.constant 3 : index
    %c0_23 = arith.constant 0 : index
    %c0_24 = arith.constant 0 : index
    %41 = vector.load %arg3[%c3, %c0_23, %c0_24] : memref<8x256x10xf32, #tpu.memory_space<vmem>>, vector<1x256x10xf32>
    %42 = vector.shape_cast %41 : vector<1x256x10xf32> to vector<256x10xf32>
    %cst_25 = arith.constant dense<0.000000e+00> : vector<2x10xf32>
    %43 = tpu.matmul %40, %42, %cst_25 {dimension_numbers = #tpu.dot_dimension_numbers<[1], [0], [0], [1], [0, 0, 1, 1], [], []>} : vector<2x256xf32>, vector<256x10xf32>, vector<2x10xf32> -> vector<2x10xf32>
    %44 = arith.addf %37, %43 : vector<2x10xf32>
    %45 = vector.extract_strided_slice %8 {offsets = [4, 0], sizes = [1, 256], strides = [1, 1]} : vector<8x256xf32> to vector<1x256xf32>
    %46 = vector.extract_strided_slice %15 {offsets = [4, 0], sizes = [1, 256], strides = [1, 1]} : vector<8x256xf32> to vector<1x256xf32>
    %47 = tpu.concatenate %45, %46 in 0 : vector<1x256xf32>, vector<1x256xf32> -> vector<2x256xf32>
    %c4 = arith.constant 4 : index
    %c0_26 = arith.constant 0 : index
    %c0_27 = arith.constant 0 : index
    %48 = vector.load %arg3[%c4, %c0_26, %c0_27] : memref<8x256x10xf32, #tpu.memory_space<vmem>>, vector<1x256x10xf32>
    %49 = vector.shape_cast %48 : vector<1x256x10xf32> to vector<256x10xf32>
    %cst_28 = arith.constant dense<0.000000e+00> : vector<2x10xf32>
    %50 = tpu.matmul %47, %49, %cst_28 {dimension_numbers = #tpu.dot_dimension_numbers<[1], [0], [0], [1], [0, 0, 1, 1], [], []>} : vector<2x256xf32>, vector<256x10xf32>, vector<2x10xf32> -> vector<2x10xf32>
    %51 = arith.addf %44, %50 : vector<2x10xf32>
    %52 = vector.extract_strided_slice %8 {offsets = [5, 0], sizes = [1, 256], strides = [1, 1]} : vector<8x256xf32> to vector<1x256xf32>
    %53 = vector.extract_strided_slice %15 {offsets = [5, 0], sizes = [1, 256], strides = [1, 1]} : vector<8x256xf32> to vector<1x256xf32>
    %54 = tpu.concatenate %52, %53 in 0 : vector<1x256xf32>, vector<1x256xf32> -> vector<2x256xf32>
    %c5 = arith.constant 5 : index
    %c0_29 = arith.constant 0 : index
    %c0_30 = arith.constant 0 : index
    %55 = vector.load %arg3[%c5, %c0_29, %c0_30] : memref<8x256x10xf32, #tpu.memory_space<vmem>>, vector<1x256x10xf32>
    %56 = vector.shape_cast %55 : vector<1x256x10xf32> to vector<256x10xf32>
    %cst_31 = arith.constant dense<0.000000e+00> : vector<2x10xf32>
    %57 = tpu.matmul %54, %56, %cst_31 {dimension_numbers = #tpu.dot_dimension_numbers<[1], [0], [0], [1], [0, 0, 1, 1], [], []>} : vector<2x256xf32>, vector<256x10xf32>, vector<2x10xf32> -> vector<2x10xf32>
    %58 = arith.addf %51, %57 : vector<2x10xf32>
    %59 = vector.extract_strided_slice %8 {offsets = [6, 0], sizes = [1, 256], strides = [1, 1]} : vector<8x256xf32> to vector<1x256xf32>
    %60 = vector.extract_strided_slice %15 {offsets = [6, 0], sizes = [1, 256], strides = [1, 1]} : vector<8x256xf32> to vector<1x256xf32>
    %61 = tpu.concatenate %59, %60 in 0 : vector<1x256xf32>, vector<1x256xf32> -> vector<2x256xf32>
    %c6 = arith.constant 6 : index
    %c0_32 = arith.constant 0 : index
    %c0_33 = arith.constant 0 : index
    %62 = vector.load %arg3[%c6, %c0_32, %c0_33] : memref<8x256x10xf32, #tpu.memory_space<vmem>>, vector<1x256x10xf32>
    %63 = vector.shape_cast %62 : vector<1x256x10xf32> to vector<256x10xf32>
    %cst_34 = arith.constant dense<0.000000e+00> : vector<2x10xf32>
    %64 = tpu.matmul %61, %63, %cst_34 {dimension_numbers = #tpu.dot_dimension_numbers<[1], [0], [0], [1], [0, 0, 1, 1], [], []>} : vector<2x256xf32>, vector<256x10xf32>, vector<2x10xf32> -> vector<2x10xf32>
    %65 = arith.addf %58, %64 : vector<2x10xf32>
    %66 = vector.extract_strided_slice %8 {offsets = [7, 0], sizes = [1, 256], strides = [1, 1]} : vector<8x256xf32> to vector<1x256xf32>
    %67 = vector.extract_strided_slice %15 {offsets = [7, 0], sizes = [1, 256], strides = [1, 1]} : vector<8x256xf32> to vector<1x256xf32>
    %68 = tpu.concatenate %66, %67 in 0 : vector<1x256xf32>, vector<1x256xf32> -> vector<2x256xf32>
    %c7 = arith.constant 7 : index
    %c0_35 = arith.constant 0 : index
    %c0_36 = arith.constant 0 : index
    %69 = vector.load %arg3[%c7, %c0_35, %c0_36] : memref<8x256x10xf32, #tpu.memory_space<vmem>>, vector<1x256x10xf32>
    %70 = vector.shape_cast %69 : vector<1x256x10xf32> to vector<256x10xf32>
    %cst_37 = arith.constant dense<0.000000e+00> : vector<2x10xf32>
    %71 = tpu.matmul %68, %70, %cst_37 {dimension_numbers = #tpu.dot_dimension_numbers<[1], [0], [0], [1], [0, 0, 1, 1], [], []>} : vector<2x256xf32>, vector<256x10xf32>, vector<2x10xf32> -> vector<2x10xf32>
    %72 = arith.addf %65, %71 : vector<2x10xf32>
    %c0_38 = arith.constant 0 : index
    %c0_39 = arith.constant 0 : index
    %73 = vector.load %arg4[%c0_38, %c0_39] : memref<1x10xf32, #tpu.memory_space<vmem>>, vector<1x10xf32>
    %74 = vector.broadcast %73 : vector<1x10xf32> to vector<2x10xf32>
    %75 = arith.addf %72, %74 : vector<2x10xf32>
    %c0_40 = arith.constant 0 : index
    %c0_41 = arith.constant 0 : index
    %76 = vector.load %arg5[%c0_40, %c0_41] : memref<2x10xf32, #tpu.memory_space<vmem>>, vector<2x10xf32>
    tpu.vector_store %arg5[%c0_40, %c0_41], %75 {strides = array<i32>} : memref<2x10xf32, #tpu.memory_space<vmem>>, vector<2x10xf32>,
    return
  }
}

</mosaic_0001>

<bundles_post_ra>
// kernel: single_head_forward.1
= control target key start
LH: loop header
LB: loop body
LE: loop exit
PB: predicated region body
PF: predicated region fallthrough
CT: control target
= control target key end

     0   :  { %vm42_vm0 = vcmask 1043456   ;;  %vm38_vm1 = vcmask 293888   ;;  %v1111_v26 = vmov 0   ;;  %s2051_s0 = inlined_call_operand.vmem [shape: f32[2,36,256], index: 0, kind: input, shape index: {}]   ;;  %s2052_s1 = inlined_call_operand.vmem [shape: f32[8,36], index: 1, kind: input, shape index: {}]   ;;  %s2053_s2 = inlined_call_operand.vmem [shape: f32[8,1], index: 2, kind: input, shape index: {}]   ;;  %s2054_s3 = inlined_call_operand.vmem [shape: f32[8,256,10], index: 3, kind: input, shape index: {}]   ;;  %s2055_s4 = inlined_call_operand.vmem [shape: f32[1,10], index: 4, kind: input, shape index: {}]   ;;  %s2056_s5 = inlined_call_operand.hbm [shape: f32[2,10], index: 5, kind: output, shape index: {}]  }
   0x1   :  { %v851_v0 = vld [vmem:[%s2051_s0 + $0x90] sm:$0xf]  ;;  %v852_v1 = vld [vmem:[%s2051_s0 + $0x98] sm:$0xf]  ;;  %v849_v2 = vld [vmem:[%s2051_s0 + $0x80] sm:$0xff]  ;;  %1083 = vset.pattern.permute.xlu0 %v1111_v26 }
   0x2   :  { %853 = vmatpush.msk.msra.mxu2 %vm42_vm0, %v851_v0  ;;  %855 = vmatpush.msk.msra.mxu3 %vm42_vm0, %v852_v1  ;;  %v850_v3 = vld [vmem:[%s2051_s0 + $0x88] sm:$0xff]  ;;  %v31_v4 = vld [vmem:[%s2051_s0 + $0x40] sm:$0xf]  ;;  %v847_v6 = vld [vmem:[%s2051_s0 + $0x70] sm:$0xff] }
   0x3   :  { %v32_v5 = vld [vmem:[%s2051_s0 + $0x48] sm:$0xf]  ;;  %839 = vmatpush.msk.msra.mxu0 %vm42_vm0, %v31_v4  ;;  %v848_v7 = vld [vmem:[%s2051_s0 + $0x78] sm:$0xff]  ;;  %v29_v8 = vld [vmem:[%s2051_s0 + $0x30] sm:$0xff] }
   0x4   :  { %841 = vmatpush.msk.msra.mxu1 %vm42_vm0, %v32_v5  ;;  %120 = vmatpush.msra.mxu2 %v849_v2  ;;  %v30_v9 = vld [vmem:[%s2051_s0 + $0x38] sm:$0xff]  ;;  %v845_v10 = vld [vmem:[%s2051_s0 + $0x60] sm:$0xff]  ;;  %v846_v11 = vld [vmem:[%s2051_s0 + $0x68] sm:$0xff] }
   0x5   :  { %140 = vmatpush.msra.mxu3 %v850_v3  ;;  %61 = vmatpush.msra.mxu0 %v29_v8  ;;  %v27_v12 = vld [vmem:[%s2051_s0 + $0x20] sm:$0xff]  ;;  %v28_v13 = vld [vmem:[%s2051_s0 + $0x28] sm:$0xff]  ;;  %v25_v14 = vld [vmem:[%s2051_s0 + $0x10] sm:$0xff] }
   0x6   :  { %81 = vmatpush.msra.mxu1 %v30_v9  ;;  %121 = vmatpush.msra.mxu2 %v847_v6  ;;  %v843_v15 = vld [vmem:[%s2051_s0 + $0x50] sm:$0xff]  ;;  %v844_v16 = vld [vmem:[%s2051_s0 + $0x58] sm:$0xff]  ;;  %v21_v18 = vld [vmem:[%s2052_s1] sm:$0xff] }
   0x7   :  { %141 = vmatpush.msra.mxu3 %v848_v7  ;;  %62 = vmatpush.msra.mxu0 %v27_v12  ;;  %v26_v17 = vld [vmem:[%s2051_s0 + $0x18] sm:$0xff]  ;;  %v23_v19 = vld [vmem:[%s2051_s0] sm:$0xff]  ;;  %v24_v20 = vld [vmem:[%s2051_s0 + $0x8] sm:$0xff] }
   0x8   :  { %82 = vmatpush.msra.mxu1 %v28_v13  ;;  %122 = vmatpush.msra.mxu2 %v845_v10  ;;  %v872_v21 = vld [vmem:[%s2054_s3 + $0x178] sm:$0xff]  ;;  %v22_v22 = vld [vmem:[%s2053_s2] sm:$0xff]  ;;  %v871_v24 = vld [vmem:[%s2054_s3 + $0x170] sm:$0xff] }
   0x9   :  { %142 = vmatpush.msra.mxu3 %v846_v11  ;;  %63 = vmatpush.msra.mxu0 %v25_v14  ;;  %v888_v23 = vld [vmem:[%s2054_s3 + $0x1f8] sm:$0xff]  ;;  %v887_v27 = vld [vmem:[%s2054_s3 + $0x1f0] sm:$0xff]  ;;  %v870_v29 = vld [vmem:[%s2054_s3 + $0x168] sm:$0xff] }
   0xa   :  { %83 = vmatpush.msra.mxu1 %v26_v17  ;;  %123 = vmatpush.msra.mxu2 %v843_v15  ;;  %v174_v25 = vld [vmem:[%s2054_s3 + $0x78] sm:$0xff]  ;;  %v173_v30 = vld [vmem:[%s2054_s3 + $0x70] sm:$0xff]  ;;  %v886_v31 = vld [vmem:[%s2054_s3 + $0x1e8] sm:$0xff] }
   0xb   :  { %143 = vmatpush.msra.mxu3 %v844_v16  ;;  %854 = vmatmul.msk.f32.vlgmr.msra.gmra.mxu2 %vm38_vm1, %v21_v18  ;;  %v190_v28 = vld [vmem:[%s2054_s3 + $0xf8] sm:$0xff]  ;;  %v189_v32 = vld [vmem:[%s2054_s3 + $0xf0] sm:$0xff]  ;;  %v869_v33 = vld [vmem:[%s2054_s3 + $0x160] sm:$0xff] }
   0xc   :  { %856 = vmatmul.msk.f32.vlgmr.msra.gmra.mxu3 %vm38_vm1, %v21_v18  ;;  %64 = vmatpush.msra.mxu0 %v23_v19  ;;  %v172_v34 = vld [vmem:[%s2054_s3 + $0x68] sm:$0xff]  ;;  %v885_v35 = vld [vmem:[%s2054_s3 + $0x1e0] sm:$0xff]  ;;  %v868_v37 = vld [vmem:[%s2054_s3 + $0x158] sm:$0xff] }
   0xd   :  { %84 = vmatpush.msra.mxu1 %v24_v20  ;;  %840 = vmatmul.msk.f32.vlgmr.msra.gmra.mxu0 %vm38_vm1, %v21_v18  ;;  %v188_v36 = vld [vmem:[%s2054_s3 + $0xe8] sm:$0xff]  ;;  %v171_v38 = vld [vmem:[%s2054_s3 + $0x60] sm:$0xff]  ;;  %v884_v39 = vld [vmem:[%s2054_s3 + $0x1d8] sm:$0xff] }
   0xe   :  { %842 = vmatmul.msk.f32.vlgmr.msra.gmra.mxu1 %vm38_vm1, %v21_v18  ;;  %232 = vmatpush.msrb.mxu0 %v872_v21  ;;  %v187_v40 = vld [vmem:[%s2054_s3 + $0xe0] sm:$0xff]  ;;  %v867_v41 = vld [vmem:[%s2054_s3 + $0x150] sm:$0xff]  ;;  %v170_v42 = vld [vmem:[%s2054_s3 + $0x58] sm:$0xff] }
   0xf   :  { %35 = vperm.xlu0 %1083, %v22_v22   ;;  %252 = vmatpush.msrb.mxu1 %v888_v23  ;;  %v883_v43 = vld [vmem:[%s2054_s3 + $0x1d0] sm:$0xff]  ;;  %v186_v44 = vld [vmem:[%s2054_s3 + $0xd8] sm:$0xff]  ;;  %v866_v45 = vld [vmem:[%s2054_s3 + $0x148] sm:$0xff] }
  0x10   :  { %233 = vmatpush.msrb.mxu0 %v871_v24  ;;  %272 = vmatpush.msrb.mxu2 %v174_v25  ;;  %v169_v46 = vld [vmem:[%s2054_s3 + $0x50] sm:$0xff]  ;;  %v882_v47 = vld [vmem:[%s2054_s3 + $0x1c8] sm:$0xff]  ;;  %v865_v49 = vld [vmem:[%s2054_s3 + $0x140] sm:$0xff] }
  0x11   :  { %253 = vmatpush.msrb.mxu1 %v887_v27  ;;  %292 = vmatpush.msrb.mxu3 %v190_v28  ;;  %v185_v48 = vld [vmem:[%s2054_s3 + $0xd0] sm:$0xff]  ;;  %v168_v50 = vld [vmem:[%s2054_s3 + $0x48] sm:$0xff]  ;;  %v881_v51 = vld [vmem:[%s2054_s3 + $0x1c0] sm:$0xff] }
  0x12   :  { %234 = vmatpush.msrb.mxu0 %v870_v29  ;;  %273 = vmatpush.msrb.mxu2 %v173_v30  ;;  %v184_v52 = vld [vmem:[%s2054_s3 + $0xc8] sm:$0xff]  ;;  %v864_v53 = vld [vmem:[%s2054_s3 + $0x138] sm:$0xff]  ;;  %v167_v54 = vld [vmem:[%s2054_s3 + $0x40] sm:$0xff] }
  0x13   :  { %254 = vmatpush.msrb.mxu1 %v886_v31  ;;  %293 = vmatpush.msrb.mxu3 %v189_v32  ;;  %v880_v55 = vld [vmem:[%s2054_s3 + $0x1b8] sm:$0xff]  ;;  %v183_v56 = vld [vmem:[%s2054_s3 + $0xc0] sm:$0xff]  ;;  %v863_v57 = vld [vmem:[%s2054_s3 + $0x130] sm:$0xff] }
  0x14   :  { %235 = vmatpush.msrb.mxu0 %v869_v33  ;;  %274 = vmatpush.msrb.mxu2 %v172_v34  ;;  %v166_v58 = vld [vmem:[%s2054_s3 + $0x38] sm:$0xff]  ;;  %v879_v59 = vld [vmem:[%s2054_s3 + $0x1b0] sm:$0xff]  ;;  %v862_v61 = vld [vmem:[%s2054_s3 + $0x128] sm:$0xff] }
  0x15   :  { %255 = vmatpush.msrb.mxu1 %v885_v35  ;;  %294 = vmatpush.msrb.mxu3 %v188_v36  ;;  %v182_v60 = vld [vmem:[%s2054_s3 + $0xb8] sm:$0xff]  ;;  %v165_v62 = vld [vmem:[%s2054_s3 + $0x30] sm:$0xff]  ;;  %v878_v63 = vld [vmem:[%s2054_s3 + $0x1a8] sm:$0xff] }
  0x16   :  { %236 = vmatpush.msrb.mxu0 %v868_v37  ;;  %275 = vmatpush.msrb.mxu2 %v171_v38  ;;  %v181_v0 = vld [vmem:[%s2054_s3 + $0xb0] sm:$0xff]  ;;  %v861_v1 = vld [vmem:[%s2054_s3 + $0x120] sm:$0xff]  ;;  %v164_v2 = vld [vmem:[%s2054_s3 + $0x28] sm:$0xff] }
  0x17   :  { %256 = vmatpush.msrb.mxu1 %v884_v39  ;;  %295 = vmatpush.msrb.mxu3 %v187_v40  ;;  %v877_v3 = vld [vmem:[%s2054_s3 + $0x1a0] sm:$0xff]  ;;  %v180_v4 = vld [vmem:[%s2054_s3 + $0xa8] sm:$0xff]  ;;  %v860_v5 = vld [vmem:[%s2054_s3 + $0x118] sm:$0xff] }
  0x18   :  { %237 = vmatpush.msrb.mxu0 %v867_v41  ;;  %276 = vmatpush.msrb.mxu2 %v170_v42  ;;  %v163_v6 = vld [vmem:[%s2054_s3 + $0x20] sm:$0xff]  ;;  %v876_v7 = vld [vmem:[%s2054_s3 + $0x198] sm:$0xff]  ;;  %v859_v9 = vld [vmem:[%s2054_s3 + $0x110] sm:$0xff] }
  0x19   :  { %257 = vmatpush.msrb.mxu1 %v883_v43  ;;  %296 = vmatpush.msrb.mxu3 %v186_v44  ;;  %v179_v8 = vld [vmem:[%s2054_s3 + $0xa0] sm:$0xff]  ;;  %v162_v10 = vld [vmem:[%s2054_s3 + $0x18] sm:$0xff]  ;;  %v875_v11 = vld [vmem:[%s2054_s3 + $0x190] sm:$0xff] }
  0x1a   :  { %238 = vmatpush.msrb.mxu0 %v866_v45  ;;  %277 = vmatpush.msrb.mxu2 %v169_v46  ;;  %v178_v12 = vld [vmem:[%s2054_s3 + $0x98] sm:$0xff]  ;;  %v858_v13 = vld [vmem:[%s2054_s3 + $0x108] sm:$0xff]  ;;  %v161_v14 = vld [vmem:[%s2054_s3 + $0x10] sm:$0xff] }
  0x1b   :  { %258 = vmatpush.msrb.mxu1 %v882_v47  ;;  %297 = vmatpush.msrb.mxu3 %v185_v48  ;;  %v874_v15 = vld [vmem:[%s2054_s3 + $0x188] sm:$0xff]  ;;  %v177_v16 = vld [vmem:[%s2054_s3 + $0x90] sm:$0xff]  ;;  %v857_v17 = vld [vmem:[%s2054_s3 + $0x100] sm:$0xff] }
  0x1c   :  { %239 = vmatpush.msrb.mxu0 %v865_v49  ;;  %278 = vmatpush.msrb.mxu2 %v168_v50  ;;  %v160_v18 = vld [vmem:[%s2054_s3 + $0x8] sm:$0xff]  ;;  %v873_v19 = vld [vmem:[%s2054_s3 + $0x180] sm:$0xff]  ;;  %v904_v21 = vld [vmem:[%s2054_s3 + $0x278] sm:$0xff] }
  0x1d   :  { %259 = vmatpush.msrb.mxu1 %v881_v51  ;;  %298 = vmatpush.msrb.mxu3 %v184_v52  ;;  %v176_v20 = vld [vmem:[%s2054_s3 + $0x88] sm:$0xff]  ;;  %v920_v22 = vld [vmem:[%s2054_s3 + $0x2f8] sm:$0xff]  ;;  %v159_v23 = vld [vmem:[%s2054_s3] sm:$0xff] }
  0x1e   :  { %240 = vmatpush.msrb.mxu0 %v864_v53  ;;  %279 = vmatpush.msrb.mxu2 %v167_v54  ;;  %v175_v24 = vld [vmem:[%s2054_s3 + $0x80] sm:$0xff]  ;;  %v903_v25 = vld [vmem:[%s2054_s3 + $0x270] sm:$0xff] }
  0x1f   :  { %260 = vmatpush.msrb.mxu1 %v880_v55  ;;  %299 = vmatpush.msrb.mxu3 %v183_v56  ;;  %v919_v26 = vld [vmem:[%s2054_s3 + $0x2f0] sm:$0xff] }
  0x20   :  { %241 = vmatpush.msrb.mxu0 %v863_v57  ;;  %280 = vmatpush.msrb.mxu2 %v166_v58 }
  0x21   :  { %261 = vmatpush.msrb.mxu1 %v879_v59  ;;  %300 = vmatpush.msrb.mxu3 %v182_v60 }
  0x22   :  { %242 = vmatpush.msrb.mxu0 %v862_v61  ;;  %281 = vmatpush.msrb.mxu2 %v165_v62 }
  0x23   :  { %262 = vmatpush.msrb.mxu1 %v878_v63  ;;  %301 = vmatpush.msrb.mxu3 %v181_v0 }
  0x24   :  { %243 = vmatpush.msrb.mxu0 %v861_v1  ;;  %282 = vmatpush.msrb.mxu2 %v164_v2 }
  0x25   :  { %263 = vmatpush.msrb.mxu1 %v877_v3  ;;  %302 = vmatpush.msrb.mxu3 %v180_v4 }
  0x26   :  { %244 = vmatpush.msrb.mxu0 %v860_v5  ;;  %283 = vmatpush.msrb.mxu2 %v163_v6 }
  0x27   :  { %264 = vmatpush.msrb.mxu1 %v876_v7  ;;  %303 = vmatpush.msrb.mxu3 %v179_v8 }
  0x28   :  { %245 = vmatpush.msrb.mxu0 %v859_v9  ;;  %284 = vmatpush.msrb.mxu2 %v162_v10 }
  0x29   :  { %265 = vmatpush.msrb.mxu1 %v875_v11  ;;  %304 = vmatpush.msrb.mxu3 %v178_v12 }
  0x2a   :  { %246 = vmatpush.msrb.mxu0 %v858_v13  ;;  %285 = vmatpush.msrb.mxu2 %v161_v14 }
  0x2b   :  { %266 = vmatpush.msrb.mxu1 %v874_v15  ;;  %305 = vmatpush.msrb.mxu3 %v177_v16 }
  0x2c   :  { %247 = vmatpush.msrb.mxu0 %v857_v17  ;;  %286 = vmatpush.msrb.mxu2 %v160_v18 }
  0x2d   :  { %267 = vmatpush.msrb.mxu1 %v873_v19  ;;  %306 = vmatpush.msrb.mxu3 %v176_v20 }
  0x2e   :  { %10 = vsyncpa [#allocation3], 0  ;;  %355 = vmatpush.msra.mxu0 %v904_v21  ;;  %v936_v27 = vld [vmem:[%s2054_s3 + $0x378] sm:$0xff]  ;;  %287 = vmatpush.msrb.mxu2 %v159_v23  ;;  %v902_v29 = vld [vmem:[%s2054_s3 + $0x268] sm:$0xff]  ;;  %vm156_vm2 = vcmask 1040384   ;;  %s1112_s19 = smov [#allocation2]  }
  0x2f   :  { %375 = vmatpush.msra.mxu1 %v920_v22  ;;  %v952_v28 = vld [vmem:[%s2054_s3 + $0x3f8] sm:$0xff]  ;;  %307 = vmatpush.msrb.mxu3 %v175_v24  ;;  %v918_v30 = vld [vmem:[%s2054_s3 + $0x2e8] sm:$0xff]  ;;  %v935_v31 = vld [vmem:[%s2054_s3 + $0x370] sm:$0xff]  ;;  %s828_s2 = sshll.u32 %s1112_s19, 4  ;;  %s830_s22 = sshll.u32 %s2056_s5, 4  ;;  %vm821_vm3 = vcmask 74752   ;;  %s829_s2 = int_to_ptr.vmem [resolvable:$true] %s828_s2  ;;  %s831_s22 = int_to_ptr.hbm [resolvable:$true] %s830_s22 }
  0x30   :  { %356 = vmatpush.msra.mxu0 %v903_v25  ;;  %v951_v32 = vld [vmem:[%s2054_s3 + $0x3f0] sm:$0xff]  ;;  %439 = vmatpush.msra.mxu2 %v936_v27  ;;  %v901_v33 = vld [vmem:[%s2054_s3 + $0x260] sm:$0xff]  ;;  %v934_v35 = vld [vmem:[%s2054_s3 + $0x368] sm:$0xff] }
  0x31   :  { %376 = vmatpush.msra.mxu1 %v919_v26  ;;  %459 = vmatpush.msra.mxu3 %v952_v28  ;;  %v917_v34 = vld [vmem:[%s2054_s3 + $0x2e0] sm:$0xff]  ;;  %v950_v36 = vld [vmem:[%s2054_s3 + $0x3e8] sm:$0xff]  ;;  %v900_v37 = vld [vmem:[%s2054_s3 + $0x258] sm:$0xff] }
  0x32   :  { %357 = vmatpush.msra.mxu0 %v902_v29  ;;  %440 = vmatpush.msra.mxu2 %v935_v31  ;;  %v916_v38 = vld [vmem:[%s2054_s3 + $0x2d8] sm:$0xff]  ;;  %v933_v39 = vld [vmem:[%s2054_s3 + $0x360] sm:$0xff]  ;;  %v899_v41 = vld [vmem:[%s2054_s3 + $0x250] sm:$0xff] }
  0x33   :  { %377 = vmatpush.msra.mxu1 %v918_v30  ;;  %460 = vmatpush.msra.mxu3 %v951_v32  ;;  %v949_v40 = vld [vmem:[%s2054_s3 + $0x3e0] sm:$0xff]  ;;  %v915_v42 = vld [vmem:[%s2054_s3 + $0x2d0] sm:$0xff]  ;;  %v932_v43 = vld [vmem:[%s2054_s3 + $0x358] sm:$0xff] }
  0x34   :  { %358 = vmatpush.msra.mxu0 %v901_v33  ;;  %441 = vmatpush.msra.mxu2 %v934_v35  ;;  %v948_v44 = vld [vmem:[%s2054_s3 + $0x3d8] sm:$0xff]  ;;  %v898_v45 = vld [vmem:[%s2054_s3 + $0x248] sm:$0xff]  ;;  %v931_v47 = vld [vmem:[%s2054_s3 + $0x350] sm:$0xff] }
  0x35   :  { %378 = vmatpush.msra.mxu1 %v917_v34  ;;  %461 = vmatpush.msra.mxu3 %v950_v36  ;;  %v914_v46 = vld [vmem:[%s2054_s3 + $0x2c8] sm:$0xff]  ;;  %v947_v48 = vld [vmem:[%s2054_s3 + $0x3d0] sm:$0xff]  ;;  %v897_v49 = vld [vmem:[%s2054_s3 + $0x240] sm:$0xff] }
  0x36   :  { %359 = vmatpush.msra.mxu0 %v900_v37  ;;  %442 = vmatpush.msra.mxu2 %v933_v39  ;;  %v913_v50 = vld [vmem:[%s2054_s3 + $0x2c0] sm:$0xff]  ;;  %v930_v51 = vld [vmem:[%s2054_s3 + $0x348] sm:$0xff]  ;;  %v896_v53 = vld [vmem:[%s2054_s3 + $0x238] sm:$0xff] }
  0x37   :  { %379 = vmatpush.msra.mxu1 %v916_v38  ;;  %462 = vmatpush.msra.mxu3 %v949_v40  ;;  %v946_v52 = vld [vmem:[%s2054_s3 + $0x3c8] sm:$0xff]  ;;  %v912_v54 = vld [vmem:[%s2054_s3 + $0x2b8] sm:$0xff]  ;;  %v929_v55 = vld [vmem:[%s2054_s3 + $0x340] sm:$0xff] }
  0x38   :  { %360 = vmatpush.msra.mxu0 %v899_v41  ;;  %443 = vmatpush.msra.mxu2 %v932_v43  ;;  %v945_v56 = vld [vmem:[%s2054_s3 + $0x3c0] sm:$0xff]  ;;  %v895_v57 = vld [vmem:[%s2054_s3 + $0x230] sm:$0xff]  ;;  %v928_v59 = vld [vmem:[%s2054_s3 + $0x338] sm:$0xff] }
  0x39   :  { %380 = vmatpush.msra.mxu1 %v915_v42  ;;  %463 = vmatpush.msra.mxu3 %v948_v44  ;;  %v911_v58 = vld [vmem:[%s2054_s3 + $0x2b0] sm:$0xff]  ;;  %v944_v60 = vld [vmem:[%s2054_s3 + $0x3b8] sm:$0xff]  ;;  %v894_v61 = vld [vmem:[%s2054_s3 + $0x228] sm:$0xff] }
  0x3a   :  { %361 = vmatpush.msra.mxu0 %v898_v45  ;;  %444 = vmatpush.msra.mxu2 %v931_v47  ;;  %v910_v62 = vld [vmem:[%s2054_s3 + $0x2a8] sm:$0xff]  ;;  %v927_v63 = vld [vmem:[%s2054_s3 + $0x330] sm:$0xff]  ;;  %v893_v1 = vld [vmem:[%s2054_s3 + $0x220] sm:$0xff] }
  0x3b   :  { %381 = vmatpush.msra.mxu1 %v914_v46  ;;  %464 = vmatpush.msra.mxu3 %v947_v48  ;;  %v943_v0 = vld [vmem:[%s2054_s3 + $0x3b0] sm:$0xff]  ;;  %v909_v2 = vld [vmem:[%s2054_s3 + $0x2a0] sm:$0xff]  ;;  %v926_v3 = vld [vmem:[%s2054_s3 + $0x328] sm:$0xff] }
  0x3c   :  { %362 = vmatpush.msra.mxu0 %v897_v49  ;;  %445 = vmatpush.msra.mxu2 %v930_v51  ;;  %v942_v4 = vld [vmem:[%s2054_s3 + $0x3a8] sm:$0xff]  ;;  %v892_v5 = vld [vmem:[%s2054_s3 + $0x218] sm:$0xff]  ;;  %v925_v7 = vld [vmem:[%s2054_s3 + $0x320] sm:$0xff] }
  0x3d   :  { %382 = vmatpush.msra.mxu1 %v913_v50  ;;  %465 = vmatpush.msra.mxu3 %v946_v52  ;;  %v908_v6 = vld [vmem:[%s2054_s3 + $0x298] sm:$0xff]  ;;  %v941_v8 = vld [vmem:[%s2054_s3 + $0x3a0] sm:$0xff]  ;;  %v891_v9 = vld [vmem:[%s2054_s3 + $0x210] sm:$0xff] }
  0x3e   :  { %363 = vmatpush.msra.mxu0 %v896_v53  ;;  %446 = vmatpush.msra.mxu2 %v929_v55  ;;  %v907_v10 = vld [vmem:[%s2054_s3 + $0x290] sm:$0xff]  ;;  %v924_v11 = vld [vmem:[%s2054_s3 + $0x318] sm:$0xff]  ;;  %v890_v13 = vld [vmem:[%s2054_s3 + $0x208] sm:$0xff] }
  0x3f   :  { %383 = vmatpush.msra.mxu1 %v912_v54  ;;  %466 = vmatpush.msra.mxu3 %v945_v56  ;;  %v940_v12 = vld [vmem:[%s2054_s3 + $0x398] sm:$0xff]  ;;  %v906_v14 = vld [vmem:[%s2054_s3 + $0x288] sm:$0xff]  ;;  %v923_v15 = vld [vmem:[%s2054_s3 + $0x310] sm:$0xff] }
  0x40   :  { %364 = vmatpush.msra.mxu0 %v895_v57  ;;  %447 = vmatpush.msra.mxu2 %v928_v59  ;;  %v939_v16 = vld [vmem:[%s2054_s3 + $0x390] sm:$0xff]  ;;  %v889_v17 = vld [vmem:[%s2054_s3 + $0x200] sm:$0xff]  ;;  %v922_v19 = vld [vmem:[%s2054_s3 + $0x308] sm:$0xff] }
  0x41   :  { %384 = vmatpush.msra.mxu1 %v911_v58  ;;  %467 = vmatpush.msra.mxu3 %v944_v60  ;;  %v905_v18 = vld [vmem:[%s2054_s3 + $0x280] sm:$0xff]  ;;  %v938_v20 = vld [vmem:[%s2054_s3 + $0x388] sm:$0xff]  ;;  %v968_v38 = vld [vmem:[%s2054_s3 + $0x478] sm:$0xff] }
  0x42   :  { %365 = vmatpush.msra.mxu0 %v894_v61  ;;  %448 = vmatpush.msra.mxu2 %v927_v63  ;;  %v921_v21 = vld [vmem:[%s2054_s3 + $0x300] sm:$0xff]  ;;  %v984_v39 = vld [vmem:[%s2054_s3 + $0x4f8] sm:$0xff]  ;;  %v967_v44 = vld [vmem:[%s2054_s3 + $0x470] sm:$0xff] }
  0x43   :  { %385 = vmatpush.msra.mxu1 %v910_v62  ;;  %468 = vmatpush.msra.mxu3 %v943_v0  ;;  %v937_v22 = vld [vmem:[%s2054_s3 + $0x380] sm:$0xff]  ;;  %v983_v45 = vld [vmem:[%s2054_s3 + $0x4f0] sm:$0xff]  ;;  %v1000_v48 = vld [vmem:[%s2054_s3 + $0x578] sm:$0xff] }
  0x44   :  { %366 = vmatpush.msra.mxu0 %v893_v1  ;;  %449 = vmatpush.msra.mxu2 %v926_v3  ;;  %v1016_v49 = vld [vmem:[%s2054_s3 + $0x5f8] sm:$0xff]  ;;  %v966_v50 = vld [vmem:[%s2054_s3 + $0x468] sm:$0xff]  ;;  %v999_v53 = vld [vmem:[%s2054_s3 + $0x570] sm:$0xff] }
  0x45   :  { %386 = vmatpush.msra.mxu1 %v909_v2  ;;  %469 = vmatpush.msra.mxu3 %v942_v4  ;;  %v982_v51 = vld [vmem:[%s2054_s3 + $0x4e8] sm:$0xff]  ;;  %v1015_v54 = vld [vmem:[%s2054_s3 + $0x5f0] sm:$0xff]  ;;  %v965_v58 = vld [vmem:[%s2054_s3 + $0x460] sm:$0xff] }
  0x46   :  { %367 = vmatpush.msra.mxu0 %v892_v5  ;;  %450 = vmatpush.msra.mxu2 %v925_v7  ;;  %v981_v59 = vld [vmem:[%s2054_s3 + $0x4e0] sm:$0xff]  ;;  %v998_v0 = vld [vmem:[%s2054_s3 + $0x568] sm:$0xff] }
  0x47   :  { %387 = vmatpush.msra.mxu1 %v908_v6  ;;  %470 = vmatpush.msra.mxu3 %v941_v8  ;;  %v1014_v1 = vld [vmem:[%s2054_s3 + $0x5e8] sm:$0xff] }
  0x48   :  { %368 = vmatpush.msra.mxu0 %v891_v9  ;;  %451 = vmatpush.msra.mxu2 %v924_v11  ;;  %v964_v9 = vld [vmem:[%s2054_s3 + $0x458] sm:$0xff] }
  0x49   :  { %388 = vmatpush.msra.mxu1 %v907_v10  ;;  %471 = vmatpush.msra.mxu3 %v940_v12  ;;  %v980_v10 = vld [vmem:[%s2054_s3 + $0x4d8] sm:$0xff] }
  0x4a   :  { %369 = vmatpush.msra.mxu0 %v890_v13  ;;  %452 = vmatpush.msra.mxu2 %v923_v15 }
  0x4b   :  { %389 = vmatpush.msra.mxu1 %v906_v14  ;;  %472 = vmatpush.msra.mxu3 %v939_v16 }
  0x4c   :  { %370 = vmatpush.msra.mxu0 %v889_v17  ;;  %453 = vmatpush.msra.mxu2 %v922_v19  ;;  %v997_v17 = vld [vmem:[%s2054_s3 + $0x560] sm:$0xff] }
  0x4d   :  { %390 = vmatpush.msra.mxu1 %v905_v18  ;;  %473 = vmatpush.msra.mxu3 %v938_v20  ;;  %v1013_v18 = vld [vmem:[%s2054_s3 + $0x5e0] sm:$0xff]  ;;  %v963_v20 = vld [vmem:[%s2054_s3 + $0x450] sm:$0xff] }
  0x4e   :  { %454 = vmatpush.msra.mxu2 %v921_v21  ;;  %v979_v21 = vld [vmem:[%s2054_s3 + $0x4d0] sm:$0xff] }
  0x4f   :  { %474 = vmatpush.msra.mxu3 %v937_v22 }
  0x81   :  { %v36_v23 = vpop.permute.xlu0 %35 }
  0x8a   :  { %v66_v24 = vpop.f32.mrf.mxu0 }
  0x8b   :  { %v86_v25 = vpop.f32.mrf.mxu1  ;;  %v67_v26 = vadd.f32 %v66_v24, %v36_v23  ;;  %v996_v24 = vld [vmem:[%s2054_s3 + $0x558] sm:$0xff] }
  0x8c   :  { %v87_v27 = vadd.f32 %v86_v25, %v36_v23  ;;  %v1012_v25 = vld [vmem:[%s2054_s3 + $0x5d8] sm:$0xff] }
  0x8d   :  { %v1593_v28 = vmax.f32 %v67_v26, 0.0  ;;  %v962_v26 = vld [vmem:[%s2054_s3 + $0x448] sm:$0xff] }
  0x8e   :  { %v1595_v29 = vmax.f32 %v87_v27, 0.0  ;;  %v125_v30 = vpop.f32.mrf.mxu2  ;;  %v978_v27 = vld [vmem:[%s2054_s3 + $0x4c8] sm:$0xff] }
  0x8f   :  { %v145_v31 = vpop.f32.mrf.mxu3  ;;  %v126_v32 = vadd.f32 %v125_v30, %v36_v23  ;;  %v193_v34 = vrot.slane %v1593_v28, 1  ;;  %v648_v52 = vrot.slane %v1593_v28, 6  ;;  %v312_v55 = vrot.slane %v1593_v28, 2  ;;  %v995_v30 = vld [vmem:[%s2054_s3 + $0x550] sm:$0xff] }
  0x90   :  { %v146_v33 = vadd.f32 %v145_v31, %v36_v23  ;;  %v194_v35 = vrot.slane %v1595_v29, 1  ;;  %v313_v57 = vrot.slane %v1595_v29, 2  ;;  %v649_v62 = vrot.slane %v1595_v29, 6  ;;  %v1011_v31 = vld [vmem:[%s2054_s3 + $0x5d0] sm:$0xff] }
  0x91   :  { %v1599_v36 = vmax.f32 %v126_v32, 0.0  ;;  %v732_v2 = vrot.slane %v1593_v28, 7  ;;  %v733_v4 = vrot.slane %v1595_v29, 7  ;;  %v396_v5 = vrot.slane %v1593_v28, 3  ;;  %v961_v32 = vld [vmem:[%s2054_s3 + $0x440] sm:$0xff] }
  0x92   :  { %v1601_v37 = vmax.f32 %v146_v33, 0.0  ;;  %v397_v12 = vrot.slane %v1595_v29, 3  ;;  %v977_v33 = vld [vmem:[%s2054_s3 + $0x4c0] sm:$0xff] }
  0x93   :  { %v197_v40 = vsel %vm156_vm2, %v193_v34, %v1599_v36  ;;  %v152_v42 = vrot.slane %v1599_v36, 7  ;;  %v316_v56 = vrot.slane %v1599_v36, 1  ;;  %v652_v61 = vrot.slane %v1599_v36, 5  ;;  %v994_v34 = vld [vmem:[%s2054_s3 + $0x548] sm:$0xff] }
  0x94   :  { %v198_v41 = vsel %vm156_vm2, %v194_v35, %v1601_v37  ;;  %v153_v43 = vrot.slane %v1601_v37, 7  ;;  %248 = vmatmul.f32.vlgmr.msrb.gmra.mxu0 %v197_v40  ;;  %v317_v60 = vrot.slane %v1601_v37, 1  ;;  %v653_v63 = vrot.slane %v1601_v37, 5  ;;  %v1010_v35 = vld [vmem:[%s2054_s3 + $0x5c8] sm:$0xff]  ;;  %v993_v40 = vld [vmem:[%s2054_s3 + $0x540] sm:$0xff] }
  0x95   :  { %268 = vmatmul.f32.vlgmr.msrb.gmra.mxu1 %v198_v41  ;;  %523 = vmatpush.msrb.mxu0 %v968_v38  ;;  %v157_v46 = vsel %vm156_vm2, %v1593_v28, %v152_v42  ;;  %v736_v3 = vrot.slane %v1599_v36, 6  ;;  %v1668_v6 = vsel %vm156_vm2, %v648_v52, %v652_v61  ;;  %v737_v8 = vrot.slane %v1601_v37, 6  ;;  %v960_v38 = vld [vmem:[%s2054_s3 + $0x438] sm:$0xff]  ;;  %v1009_v41 = vld [vmem:[%s2054_s3 + $0x5c0] sm:$0xff]  ;;  %v959_v42 = vld [vmem:[%s2054_s3 + $0x430] sm:$0xff] }
  0x96   :  { %543 = vmatpush.msrb.mxu1 %v984_v39  ;;  %v158_v47 = vsel %vm156_vm2, %v1595_v29, %v153_v43  ;;  %288 = vmatmul.f32.vlgmr.msrb.gmra.mxu2 %v157_v46  ;;  %v1671_v7 = vsel %vm156_vm2, %v649_v62, %v653_v63  ;;  %v400_v11 = vrot.slane %v1599_v36, 2  ;;  %v401_v13 = vrot.slane %v1601_v37, 2  ;;  %v976_v39 = vld [vmem:[%s2054_s3 + $0x4b8] sm:$0xff]  ;;  %v975_v43 = vld [vmem:[%s2054_s3 + $0x4b0] sm:$0xff]  ;;  %v958_v46 = vld [vmem:[%s2054_s3 + $0x428] sm:$0xff] }
  0x97   :  { %308 = vmatmul.f32.vlgmr.msrb.gmra.mxu3 %v158_v47  ;;  %524 = vmatpush.msrb.mxu0 %v967_v44  ;;  %v1684_v14 = vsel %vm156_vm2, %v732_v2, %v736_v3  ;;  %v320_v15 = vsel %vm156_vm2, %v312_v55, %v316_v56  ;;  %v321_v16 = vsel %vm156_vm2, %v313_v57, %v317_v60  ;;  %v992_v44 = vld [vmem:[%s2054_s3 + $0x538] sm:$0xff]  ;;  %v974_v47 = vld [vmem:[%s2054_s3 + $0x4a8] sm:$0xff]  ;;  %v989_v56 = vld [vmem:[%s2054_s3 + $0x520] sm:$0xff] }
  0x98   :  { %544 = vmatpush.msrb.mxu1 %v983_v45  ;;  %607 = vmatpush.msrb.mxu2 %v1000_v48  ;;  %v1695_v19 = vsel %vm156_vm2, %v733_v4, %v737_v8  ;;  %v404_v22 = vsel %vm156_vm2, %v396_v5, %v400_v11  ;;  %v405_v23 = vsel %vm156_vm2, %v397_v12, %v401_v13  ;;  %v1008_v45 = vld [vmem:[%s2054_s3 + $0x5b8] sm:$0xff]  ;;  %v991_v48 = vld [vmem:[%s2054_s3 + $0x530] sm:$0xff]  ;;  %v990_v52 = vld [vmem:[%s2054_s3 + $0x528] sm:$0xff]  ;;  %v480_v4 = vrot.slane %v1593_v28, 4 }
  0x99   :  { %627 = vmatpush.msrb.mxu3 %v1016_v49  ;;  %525 = vmatpush.msrb.mxu0 %v966_v50  ;;  %v1007_v49 = vld [vmem:[%s2054_s3 + $0x5b0] sm:$0xff]  ;;  %v957_v50 = vld [vmem:[%s2054_s3 + $0x420] sm:$0xff]  ;;  %v972_v55 = vld [vmem:[%s2054_s3 + $0x498] sm:$0xff]  ;;  %v484_v5 = vrot.slane %v1599_v36, 3  ;;  %v481_v8 = vrot.slane %v1595_v29, 4 }
  0x9a   :  { %545 = vmatpush.msrb.mxu1 %v982_v51  ;;  %608 = vmatpush.msrb.mxu2 %v999_v53  ;;  %v973_v51 = vld [vmem:[%s2054_s3 + $0x4a0] sm:$0xff]  ;;  %v1006_v53 = vld [vmem:[%s2054_s3 + $0x5a8] sm:$0xff]  ;;  %v988_v60 = vld [vmem:[%s2054_s3 + $0x518] sm:$0xff] }
  0x9b   :  { %628 = vmatpush.msrb.mxu3 %v1015_v54  ;;  %526 = vmatpush.msrb.mxu0 %v965_v58  ;;  %v956_v54 = vld [vmem:[%s2054_s3 + $0x418] sm:$0xff]  ;;  %v1005_v57 = vld [vmem:[%s2054_s3 + $0x5a0] sm:$0xff]  ;;  %v955_v58 = vld [vmem:[%s2054_s3 + $0x410] sm:$0xff] }
  0x9c   :  { %546 = vmatpush.msrb.mxu1 %v981_v59  ;;  %609 = vmatpush.msrb.mxu2 %v998_v0  ;;  %v971_v59 = vld [vmem:[%s2054_s3 + $0x490] sm:$0xff]  ;;  %v1004_v61 = vld [vmem:[%s2054_s3 + $0x598] sm:$0xff]  ;;  %v954_v62 = vld [vmem:[%s2054_s3 + $0x408] sm:$0xff] }
  0x9d   :  { %629 = vmatpush.msrb.mxu3 %v1014_v1  ;;  %371 = vmatmul.f32.vlgmr.msra.gmra.mxu0 %v320_v15  ;;  %v970_v63 = vld [vmem:[%s2054_s3 + $0x488] sm:$0xff]  ;;  %v987_v0 = vld [vmem:[%s2054_s3 + $0x510] sm:$0xff]  ;;  %v953_v2 = vld [vmem:[%s2054_s3 + $0x400] sm:$0xff]  ;;  %v564_v15 = vrot.slane %v1593_v28, 5 }
  0x9e   :  { %391 = vmatmul.f32.vlgmr.msra.gmra.mxu1 %v321_v16  ;;  %527 = vmatpush.msrb.mxu0 %v964_v9  ;;  %v1003_v1 = vld [vmem:[%s2054_s3 + $0x590] sm:$0xff]  ;;  %v969_v3 = vld [vmem:[%s2054_s3 + $0x480] sm:$0xff]  ;;  %v485_v9 = vrot.slane %v1601_v37, 3  ;;  %v1002_v11 = vld [vmem:[%s2054_s3 + $0x588] sm:$0xff]  ;;  %v568_v16 = vrot.slane %v1599_v36, 4 }
  0x9f   :  { %547 = vmatpush.msrb.mxu1 %v980_v10  ;;  %610 = vmatpush.msrb.mxu2 %v997_v17  ;;  %v986_v10 = vld [vmem:[%s2054_s3 + $0x508] sm:$0xff]  ;;  %v1032_v12 = vld [vmem:[%s2054_s3 + $0x678] sm:$0xff]  ;;  %v565_v17 = vrot.slane %v1595_v29, 5  ;;  %v1001_v28 = vld [vmem:[%s2054_s3 + $0x580] sm:$0xff] }
  0xa0   :  { %630 = vmatpush.msrb.mxu3 %v1013_v18  ;;  %455 = vmatmul.f32.vlgmr.msra.gmra.mxu2 %v404_v22  ;;  %v1048_v13 = vld [vmem:[%s2054_s3 + $0x6f8] sm:$0xff]  ;;  %v569_v18 = vrot.slane %v1601_v37, 4  ;;  %v985_v22 = vld [vmem:[%s2054_s3 + $0x500] sm:$0xff]  ;;  %v1031_v29 = vld [vmem:[%s2054_s3 + $0x670] sm:$0xff]  ;;  %v572_v37 = vsel %vm156_vm2, %v564_v15, %v568_v16 }
  0xa1   :  { %475 = vmatmul.f32.vlgmr.msra.gmra.mxu3 %v405_v23  ;;  %528 = vmatpush.msrb.mxu0 %v963_v20  ;;  %v488_v20 = vsel %vm156_vm2, %v480_v4, %v484_v5  ;;  %v1047_v36 = vld [vmem:[%s2054_s3 + $0x6f0] sm:$0xff]  ;;  %v1054_v4 = vld [vmem:[%s2054_s3 + $0x728] sm:$0xff]  ;;  %v1052_v15 = vld [vmem:[%s2054_s3 + $0x718] sm:$0xff] }
  0xa2   :  { %548 = vmatpush.msrb.mxu1 %v979_v21  ;;  %611 = vmatpush.msrb.mxu2 %v996_v24  ;;  %v489_v21 = vsel %vm156_vm2, %v481_v8, %v485_v9  ;;  %v573_v23 = vsel %vm156_vm2, %v565_v17, %v569_v18  ;;  %v1064_v24 = vld [vmem:[%s2054_s3 + $0x778] sm:$0xff]  ;;  %v1070_v5 = vld [vmem:[%s2054_s3 + $0x7a8] sm:$0xff] }
  0xa3   :  { %631 = vmatpush.msrb.mxu3 %v1012_v25  ;;  %529 = vmatpush.msrb.mxu0 %v962_v26  ;;  %v1080_v25 = vld [vmem:[%s2054_s3 + $0x7f8] sm:$0xff]  ;;  %v1030_v26 = vld [vmem:[%s2054_s3 + $0x668] sm:$0xff] }
  0xa4   :  { %549 = vmatpush.msrb.mxu1 %v978_v27  ;;  %612 = vmatpush.msrb.mxu2 %v995_v30  ;;  %v1046_v27 = vld [vmem:[%s2054_s3 + $0x6e8] sm:$0xff]  ;;  %v1063_v30 = vld [vmem:[%s2054_s3 + $0x770] sm:$0xff]  ;;  %v1020_v8 = vld [vmem:[%s2054_s3 + $0x618] sm:$0xff] }
  0xa5   :  { %632 = vmatpush.msrb.mxu3 %v1011_v31  ;;  %530 = vmatpush.msrb.mxu0 %v961_v32  ;;  %v1079_v31 = vld [vmem:[%s2054_s3 + $0x7f0] sm:$0xff]  ;;  %v1029_v32 = vld [vmem:[%s2054_s3 + $0x660] sm:$0xff]  ;;  %v1036_v9 = vld [vmem:[%s2054_s3 + $0x698] sm:$0xff] }
  0xa6   :  { %550 = vmatpush.msrb.mxu1 %v977_v33  ;;  %613 = vmatpush.msrb.mxu2 %v994_v34  ;;  %v1045_v33 = vld [vmem:[%s2054_s3 + $0x6e0] sm:$0xff]  ;;  %v1062_v34 = vld [vmem:[%s2054_s3 + $0x768] sm:$0xff]  ;;  %v1068_v16 = vld [vmem:[%s2054_s3 + $0x798] sm:$0xff] }
  0xa7   :  { %633 = vmatpush.msrb.mxu3 %v1010_v35  ;;  %531 = vmatpush.msrb.mxu0 %v960_v38  ;;  %v1078_v35 = vld [vmem:[%s2054_s3 + $0x7e8] sm:$0xff]  ;;  %v1028_v38 = vld [vmem:[%s2054_s3 + $0x658] sm:$0xff] }
  0xa8   :  { %551 = vmatpush.msrb.mxu1 %v976_v39  ;;  %614 = vmatpush.msrb.mxu2 %v993_v40  ;;  %v1044_v39 = vld [vmem:[%s2054_s3 + $0x6d8] sm:$0xff]  ;;  %v1061_v40 = vld [vmem:[%s2054_s3 + $0x760] sm:$0xff]  ;;  %v1018_v17 = vld [vmem:[%s2054_s3 + $0x608] sm:$0xff] }
  0xa9   :  { %634 = vmatpush.msrb.mxu3 %v1009_v41  ;;  %532 = vmatpush.msrb.mxu0 %v959_v42  ;;  %v1077_v41 = vld [vmem:[%s2054_s3 + $0x7e0] sm:$0xff]  ;;  %v1027_v42 = vld [vmem:[%s2054_s3 + $0x650] sm:$0xff]  ;;  %v1034_v18 = vld [vmem:[%s2054_s3 + $0x688] sm:$0xff] }
  0xaa   :  { %552 = vmatpush.msrb.mxu1 %v975_v43  ;;  %615 = vmatpush.msrb.mxu2 %v992_v44  ;;  %v1043_v43 = vld [vmem:[%s2054_s3 + $0x6d0] sm:$0xff]  ;;  %v1060_v44 = vld [vmem:[%s2054_s3 + $0x758] sm:$0xff] }
  0xab   :  { %635 = vmatpush.msrb.mxu3 %v1008_v45  ;;  %533 = vmatpush.msrb.mxu0 %v958_v46  ;;  %v1076_v45 = vld [vmem:[%s2054_s3 + $0x7d8] sm:$0xff]  ;;  %v1026_v46 = vld [vmem:[%s2054_s3 + $0x648] sm:$0xff] }
  0xac   :  { %553 = vmatpush.msrb.mxu1 %v974_v47  ;;  %616 = vmatpush.msrb.mxu2 %v991_v48  ;;  %v1042_v47 = vld [vmem:[%s2054_s3 + $0x6c8] sm:$0xff]  ;;  %v1059_v48 = vld [vmem:[%s2054_s3 + $0x750] sm:$0xff] }
  0xad   :  { %636 = vmatpush.msrb.mxu3 %v1007_v49  ;;  %534 = vmatpush.msrb.mxu0 %v957_v50  ;;  %v1075_v49 = vld [vmem:[%s2054_s3 + $0x7d0] sm:$0xff]  ;;  %v1025_v50 = vld [vmem:[%s2054_s3 + $0x640] sm:$0xff] }
  0xae   :  { %554 = vmatpush.msrb.mxu1 %v973_v51  ;;  %617 = vmatpush.msrb.mxu2 %v990_v52  ;;  %v1041_v51 = vld [vmem:[%s2054_s3 + $0x6c0] sm:$0xff]  ;;  %v1058_v52 = vld [vmem:[%s2054_s3 + $0x748] sm:$0xff] }
  0xaf   :  { %637 = vmatpush.msrb.mxu3 %v1006_v53  ;;  %535 = vmatpush.msrb.mxu0 %v956_v54  ;;  %v1074_v53 = vld [vmem:[%s2054_s3 + $0x7c8] sm:$0xff]  ;;  %v1024_v54 = vld [vmem:[%s2054_s3 + $0x638] sm:$0xff] }
  0xb0   :  { %555 = vmatpush.msrb.mxu1 %v972_v55  ;;  %618 = vmatpush.msrb.mxu2 %v989_v56  ;;  %v1040_v55 = vld [vmem:[%s2054_s3 + $0x6b8] sm:$0xff]  ;;  %v1057_v56 = vld [vmem:[%s2054_s3 + $0x740] sm:$0xff] }
  0xb1   :  { %638 = vmatpush.msrb.mxu3 %v1005_v57  ;;  %536 = vmatpush.msrb.mxu0 %v955_v58  ;;  %v1073_v57 = vld [vmem:[%s2054_s3 + $0x7c0] sm:$0xff]  ;;  %v1023_v58 = vld [vmem:[%s2054_s3 + $0x630] sm:$0xff] }
  0xb2   :  { %556 = vmatpush.msrb.mxu1 %v971_v59  ;;  %619 = vmatpush.msrb.mxu2 %v988_v60  ;;  %v1039_v59 = vld [vmem:[%s2054_s3 + $0x6b0] sm:$0xff]  ;;  %v1056_v60 = vld [vmem:[%s2054_s3 + $0x738] sm:$0xff] }
  0xb3   :  { %639 = vmatpush.msrb.mxu3 %v1004_v61  ;;  %537 = vmatpush.msrb.mxu0 %v954_v62  ;;  %v1072_v61 = vld [vmem:[%s2054_s3 + $0x7b8] sm:$0xff]  ;;  %v1022_v62 = vld [vmem:[%s2054_s3 + $0x628] sm:$0xff] }
  0xb4   :  { %557 = vmatpush.msrb.mxu1 %v970_v63  ;;  %620 = vmatpush.msrb.mxu2 %v987_v0  ;;  %v1038_v63 = vld [vmem:[%s2054_s3 + $0x6a8] sm:$0xff]  ;;  %v1055_v0 = vld [vmem:[%s2054_s3 + $0x730] sm:$0xff] }
  0xb5   :  { %640 = vmatpush.msrb.mxu3 %v1003_v1  ;;  %538 = vmatpush.msrb.mxu0 %v953_v2  ;;  %v1071_v1 = vld [vmem:[%s2054_s3 + $0x7b0] sm:$0xff]  ;;  %v1021_v2 = vld [vmem:[%s2054_s3 + $0x620] sm:$0xff] }
  0xb6   :  { %558 = vmatpush.msrb.mxu1 %v969_v3  ;;  %621 = vmatpush.msrb.mxu2 %v986_v10  ;;  %v1037_v3 = vld [vmem:[%s2054_s3 + $0x6a0] sm:$0xff] }
  0xb7   :  { %641 = vmatpush.msrb.mxu3 %v1002_v11  ;;  %539 = vmatmul.f32.vlgmr.msrb.gmra.mxu0 %v488_v20  ;;  %v1053_v10 = vld [vmem:[%s2054_s3 + $0x720] sm:$0xff]  ;;  %v1051_v20 = vld [vmem:[%s2054_s3 + $0x710] sm:$0xff] }
  0xb8   :  { %559 = vmatmul.f32.vlgmr.msrb.gmra.mxu1 %v489_v21  ;;  %691 = vmatpush.msra.mxu0 %v1032_v12  ;;  %v1069_v11 = vld [vmem:[%s2054_s3 + $0x7a0] sm:$0xff]  ;;  %v1019_v12 = vld [vmem:[%s2054_s3 + $0x610] sm:$0xff] }
  0xb9   :  { %711 = vmatpush.msra.mxu1 %v1048_v13  ;;  %622 = vmatpush.msrb.mxu2 %v985_v22  ;;  %v1035_v13 = vld [vmem:[%s2054_s3 + $0x690] sm:$0xff]  ;;  %v1017_v22 = vld [vmem:[%s2054_s3 + $0x600] sm:$0xff] }
  0xba   :  { %642 = vmatpush.msrb.mxu3 %v1001_v28  ;;  %623 = vmatmul.f32.vlgmr.msrb.gmra.mxu2 %v572_v37  ;;  %v1067_v21 = vld [vmem:[%s2054_s3 + $0x790] sm:$0xff]  ;;  %v1033_v28 = vld [vmem:[%s2054_s3 + $0x680] sm:$0xff] }
  0xbb   :  { %643 = vmatmul.f32.vlgmr.msrb.gmra.mxu3 %v573_v23  ;;  %692 = vmatpush.msra.mxu0 %v1031_v29  ;;  %v1050_v29 = vld [vmem:[%s2054_s3 + $0x708] sm:$0xff]  ;;  %v1049_v37 = vld [vmem:[%s2054_s3 + $0x700] sm:$0xff] }
  0xbc   :  { %712 = vmatpush.msra.mxu1 %v1047_v36  ;;  %775 = vmatpush.msra.mxu2 %v1064_v24  ;;  %v1066_v36 = vld [vmem:[%s2054_s3 + $0x788] sm:$0xff]  ;;  %v1065_v23 = vld [vmem:[%s2054_s3 + $0x780] sm:$0xff] }
  0xbd   :  { %795 = vmatpush.msra.mxu3 %v1080_v25  ;;  %693 = vmatpush.msra.mxu0 %v1030_v26 }
  0xbe   :  { %713 = vmatpush.msra.mxu1 %v1046_v27  ;;  %776 = vmatpush.msra.mxu2 %v1063_v30 }
  0xbf   :  { %796 = vmatpush.msra.mxu3 %v1079_v31  ;;  %694 = vmatpush.msra.mxu0 %v1029_v32 }
  0xc0   :  { %714 = vmatpush.msra.mxu1 %v1045_v33  ;;  %777 = vmatpush.msra.mxu2 %v1062_v34 }
  0xc1   :  { %797 = vmatpush.msra.mxu3 %v1078_v35  ;;  %695 = vmatpush.msra.mxu0 %v1028_v38 }
  0xc2   :  { %715 = vmatpush.msra.mxu1 %v1044_v39  ;;  %778 = vmatpush.msra.mxu2 %v1061_v40 }
  0xc3   :  { %798 = vmatpush.msra.mxu3 %v1077_v41  ;;  %696 = vmatpush.msra.mxu0 %v1027_v42 }
  0xc4   :  { %716 = vmatpush.msra.mxu1 %v1043_v43  ;;  %779 = vmatpush.msra.mxu2 %v1060_v44 }
  0xc5   :  { %799 = vmatpush.msra.mxu3 %v1076_v45  ;;  %697 = vmatpush.msra.mxu0 %v1026_v46 }
  0xc6   :  { %717 = vmatpush.msra.mxu1 %v1042_v47  ;;  %780 = vmatpush.msra.mxu2 %v1059_v48 }
  0xc7   :  { %800 = vmatpush.msra.mxu3 %v1075_v49  ;;  %698 = vmatpush.msra.mxu0 %v1025_v50 }
  0xc8   :  { %718 = vmatpush.msra.mxu1 %v1041_v51  ;;  %781 = vmatpush.msra.mxu2 %v1058_v52 }
  0xc9   :  { %801 = vmatpush.msra.mxu3 %v1074_v53  ;;  %699 = vmatpush.msra.mxu0 %v1024_v54  ;;  %v1084_v54 = vld [vmem:[%s2055_s4] ss:$0 sm:$0xff] }
  0xca   :  { %719 = vmatpush.msra.mxu1 %v1040_v55  ;;  %782 = vmatpush.msra.mxu2 %v1057_v56 }
  0xcb   :  { %802 = vmatpush.msra.mxu3 %v1073_v57  ;;  %700 = vmatpush.msra.mxu0 %v1023_v58 }
  0xcc   :  { %720 = vmatpush.msra.mxu1 %v1039_v59  ;;  %783 = vmatpush.msra.mxu2 %v1056_v60 }
  0xcd   :  { %803 = vmatpush.msra.mxu3 %v1072_v61  ;;  %701 = vmatpush.msra.mxu0 %v1022_v62 }
  0xce   :  { %721 = vmatpush.msra.mxu1 %v1038_v63  ;;  %784 = vmatpush.msra.mxu2 %v1055_v0 }
  0xcf   :  { %804 = vmatpush.msra.mxu3 %v1071_v1  ;;  %702 = vmatpush.msra.mxu0 %v1021_v2 }
  0xd0   :  { %722 = vmatpush.msra.mxu1 %v1037_v3  ;;  %785 = vmatpush.msra.mxu2 %v1054_v4 }
  0xd1   :  { %805 = vmatpush.msra.mxu3 %v1070_v5  ;;  %703 = vmatpush.msra.mxu0 %v1020_v8 }
  0xd2   :  { %723 = vmatpush.msra.mxu1 %v1036_v9  ;;  %786 = vmatpush.msra.mxu2 %v1053_v10 }
  0xd3   :  { %806 = vmatpush.msra.mxu3 %v1069_v11  ;;  %704 = vmatpush.msra.mxu0 %v1019_v12 }
  0xd4   :  { %724 = vmatpush.msra.mxu1 %v1035_v13  ;;  %787 = vmatpush.msra.mxu2 %v1052_v15 }
  0xd5   :  { %807 = vmatpush.msra.mxu3 %v1068_v16  ;;  %705 = vmatpush.msra.mxu0 %v1018_v17 }
  0xd6   :  { %725 = vmatpush.msra.mxu1 %v1034_v18  ;;  %788 = vmatpush.msra.mxu2 %v1051_v20 }
  0xd7   :  { %808 = vmatpush.msra.mxu3 %v1067_v21  ;;  %706 = vmatpush.msra.mxu0 %v1017_v22 }
  0xd8   :  { %726 = vmatpush.msra.mxu1 %v1033_v28  ;;  %789 = vmatpush.msra.mxu2 %v1050_v29 }
  0xd9   :  { %809 = vmatpush.msra.mxu3 %v1066_v36  ;;  %707 = vmatmul.f32.vlgmr.msra.gmra.mxu0 %v1668_v6 }
  0xda   :  { %727 = vmatmul.f32.vlgmr.msra.gmra.mxu1 %v1671_v7  ;;  %790 = vmatpush.msra.mxu2 %v1049_v37 }
  0xdb   :  { %810 = vmatpush.msra.mxu3 %v1065_v23  ;;  %791 = vmatmul.f32.vlgmr.msra.gmra.mxu2 %v1684_v14 }
  0xdc   :  { %811 = vmatmul.f32.vlgmr.msra.gmra.mxu3 %v1695_v19 }
 0x111   :  { %v249_v24 = vpop.f32.mrf.mxu0 }
 0x112   :  { %v269_v25 = vpop.f32.mrf.mxu1 }
 0x113   :  { %v270_v32 = vadd.f32 %v269_v25, %v249_v24 }
 0x119   :  { %v289_v26 = vpop.f32.mrf.mxu2 }
 0x11a   :  { %v309_v27 = vpop.f32.mrf.mxu3  ;;  %v372_v30 = vpop.f32.mrf.mxu0  ;;  %v290_v35 = vadd.f32 %v289_v26, %v270_v32 }
 0x11b   :  { %v392_v31 = vpop.f32.mrf.mxu1 }
 0x11c   :  { %v310_v39 = vadd.f32 %v309_v27, %v290_v35  ;;  %v393_v7 = vadd.f32 %v392_v31, %v372_v30 }
 0x11e   :  { %v395_v14 = vadd.f32 %v393_v7, %v310_v39 }
 0x123   :  { %v456_v33 = vpop.f32.mrf.mxu2 }
 0x124   :  { %v476_v34 = vpop.f32.mrf.mxu3 }
 0x125   :  { %v477_v40 = vadd.f32 %v476_v34, %v456_v33 }
 0x127   :  { %v479_v45 = vadd.f32 %v477_v40, %v395_v14 }
 0x134   :  { %v540_v38 = vpop.f32.mrf.mxu0 }
 0x135   :  { %v560_v6 = vpop.f32.mrf.mxu1 }
 0x136   :  { %v561_v43 = vadd.f32 %v560_v6, %v540_v38 }
 0x138   :  { %v563_v47 = vadd.f32 %v561_v43, %v479_v45 }
 0x13d   :  { %v624_v41 = vpop.f32.mrf.mxu2 }
 0x13e   :  { %v644_v42 = vpop.f32.mrf.mxu3 }
 0x13f   :  { %v645_v46 = vadd.f32 %v644_v42, %v624_v41 }
 0x141   :  { %v647_v49 = vadd.f32 %v645_v46, %v563_v47 }
 0x156   :  { %v708_v19 = vpop.f32.mrf.mxu0 }
 0x157   :  { %v728_v44 = vpop.f32.mrf.mxu1 }
 0x158   :  { %v729_v48 = vadd.f32 %v728_v44, %v708_v19 }
 0x15a   :  { %v731_v52 = vadd.f32 %v729_v48, %v647_v49 }
 0x15e   :  { %v792_v50 = vpop.f32.mrf.mxu2 }
 0x15f   :  { %v812_v51 = vpop.f32.mrf.mxu3 }
 0x160   :  { %v813_v53 = vadd.f32 %v812_v51, %v792_v50 }
 0x162   :  { %v815_v55 = vadd.f32 %v813_v53, %v731_v52 }
 0x164   :  { %v820_v56 = vadd.f32 %v1084_v54, %v815_v55 }
 0x166   :  { %822 = vst.msk [vmem:[#allocation2] sm:$0x3] %vm821_vm3, %v820_v56 }
 0x167   :  { %833 = dma.vmem_to_hbm [thread:$0]  %s829_s2, 32, %s831_s22, [#allocation3]  }
 0x168   :  { %1109 = dma.done.wait [#allocation3], 32  }
 0x169   :  { %1110 = vsyncadd [#allocation3], 4294967264 }
 0x16a   :  { %838 = vsyncpa [#allocation3], 1 }

</bundles_post_ra>
